<compile_context>
chip_gen: v6e
topology: v6e:2x2x1
jax: 0.10.0
libtpu: 0.0.40
codegen_flags: <defaults>
</compile_context>

<pallas_src>
import jax
import jax.numpy as jnp
from jax import lax
from jax.experimental import pallas as pl
from jax.experimental.pallas import tpu as pltpu


def _round_up(x, m):
    return (x + m - 1) // m * m


def _fused_head_kernel(ids_ref, table_ref, w_ref, b_ref, o_ref,
                       xf_sc, xb_sc, m_sc, l_sc):
    # ids_ref:   (M_pad,)     i32   token ids (SMEM, scalar-prefetched)
    # table_ref: (Vs, D)      f32   embedding table (VMEM resident, const idx)
    # w_ref:     (D, tv)      bf16  projection weight tile (streamed over V)
    # b_ref:     (1, V_pad)   f32   full bias (VMEM resident, const idx)
    # o_ref:     (tm, V_pad)  f32   output slab (resident across the V axis)
    # xf_sc:     (tm, D)      f32   gathered embeddings
    # xb_sc:     (tm, D)      bf16  bf16 copy of the embeddings (MXU operand)
    # m_sc/l_sc: (tm, 1)      f32   online logsumexp accumulators
    i = pl.program_id(0)
    j = pl.program_id(1)
    nv = pl.num_programs(1)
    tm = xf_sc.shape[0]
    tv = w_ref.shape[1]

    @pl.when(j == 0)
    def _():
        # Real gather: one dynamic-row copy per token out of the resident
        # table (no one-hot matmul, no extra MXU flops).
        base = i * tm

        def gather_row(r, carry):
            tok = ids_ref[base + r]
            xf_sc[pl.ds(r, 1), :] = table_ref[pl.ds(tok, 1), :]
            return carry

        lax.fori_loop(0, tm, gather_row, 0)
        xb_sc[...] = xf_sc[...].astype(xb_sc.dtype)   # bf16 MXU operand
        m_sc[...] = jnp.full_like(m_sc, -jnp.inf)
        l_sc[...] = jnp.zeros_like(l_sc)

    col = pl.multiple_of(j * tv, 128)

    # Logits for this V tile: bf16 operands, f32 accumulation on the MXU.
    z = jnp.dot(xb_sc[...], w_ref[...],
                preferred_element_type=jnp.float32)           # (tm, tv) f32
    z = z + b_ref[:, pl.ds(col, tv)]                          # resident bias

    # Online logsumexp across V tiles (numerically stable; pad cols carry a
    # -1e30 bias so they contribute exactly 0 to the denominator).
    m_prev = m_sc[...]
    m_new = jnp.maximum(m_prev, jnp.max(z, axis=-1, keepdims=True))
    l_sc[...] = (l_sc[...] * jnp.exp(m_prev - m_new)
                 + jnp.sum(jnp.exp(z - m_new), axis=-1, keepdims=True))
    m_sc[...] = m_new

    # Stash raw logits into the lane-dense resident output slab.
    o_ref[:, pl.ds(col, tv)] = z

    @pl.when(j == nv - 1)
    def _():
        # Normalize the whole row slab: log_softmax = z - (m + log l).
        o_ref[...] = o_ref[...] - (m_sc[...] + jnp.log(l_sc[...]))


def seq2seq_bert_forward(token_ids, embed_table, w_proj, b_proj):
    """ids (B, S) int32 -> log-probs (B, S, V) f32."""
    B, S = token_ids.shape
    src_vocab, D = embed_table.shape
    V = w_proj.shape[1]
    M = B * S

    # --- Pad the vocab axis host-side so it always streams in lane-dense
    #     (multiple-of-128) tiles; padded columns get a -1e30 bias so they do
    #     not perturb the softmax and are sliced off afterwards.
    V_pad = _round_up(V, 128)
    tv = 256 if V_pad % 256 == 0 else 128
    tv = min(tv, V_pad)

    w_bf16 = jnp.pad(w_proj.astype(jnp.bfloat16), ((0, 0), (0, V_pad - V)))
    b_pad = jnp.pad(b_proj.astype(jnp.float32), (0, V_pad - V),
                    constant_values=-1e30).reshape(1, V_pad)
    table_f32 = embed_table.astype(jnp.float32)   # f32 rows gather cleanly

    # --- Per-generation VMEM budget (v7x 64 MiB vs v5e/v6e 128 MiB), with
    #     ~15% headroom for Mosaic internal scratch / semaphores.
    try:
        vmem_cap = int(getattr(pltpu.get_tpu_info(), "vmem_capacity_bytes",
                               64 << 20))
    except Exception:
        vmem_cap = 64 << 20
    vmem_budget = int(vmem_cap * 0.85)

    def _vmem_need(tm_):
        return (2 * tm_ * V_pad * 4          # output slab (2x across row axis)
                + 2 * src_vocab * D * 4      # table (constant index map)
                + 2 * D * tv * 2             # W tiles (bf16, double-buffered)
                + 2 * V_pad * 4              # bias (constant index map)
                + tm_ * D * (4 + 2)          # gather + bf16 scratches
                + 2 * tm_ * 4)               # m/l scratches

    # Row tile: as large as the budget allows (W reuse), but at least 2 row
    # grid steps when M allows so both v7x TensorCores get work.
    tm = min(512, max(8, _round_up((M + 1) // 2, 8)))
    while tm > 8 and _vmem_need(tm) > vmem_budget:
        tm = max(8, _round_up(tm // 2, 8))
    M_pad = _round_up(M, tm)

    ids = jnp.pad(token_ids.reshape(-1).astype(jnp.int32), (0, M_pad - M))

    n_rows = M_pad // tm
    n_vt = V_pad // tv

    cost = pl.CostEstimate(
        flops=2 * M_pad * D * V_pad,
        transcendentals=M_pad * V_pad,
        bytes_accessed=(ids.size * 4
                        + table_f32.size * 4
                        + n_rows * w_bf16.size * 2    # W re-streamed per row tile
                        + b_pad.size * 4
                        + M_pad * V_pad * 4),
    )

    logp = pl.pallas_call(
        _fused_head_kernel,
        out_shape=jax.ShapeDtypeStruct((M_pad, V_pad), jnp.float32),
        grid_spec=pltpu.PrefetchScalarGridSpec(
            num_scalar_prefetch=1,                    # ids -> SMEM
            grid=(n_rows, n_vt),
            in_specs=[
                pl.BlockSpec((src_vocab, D), lambda i, j, sref: (0, 0)),  # table
                pl.BlockSpec((D, tv), lambda i, j, sref: (0, j)),          # W tile
                pl.BlockSpec((1, V_pad), lambda i, j, sref: (0, 0)),       # bias
            ],
            out_specs=pl.BlockSpec((tm, V_pad), lambda i, j, sref: (i, 0)),
            scratch_shapes=[
                pltpu.VMEM((tm, D), jnp.float32),    # gathered embeddings (f32)
                pltpu.VMEM((tm, D), jnp.bfloat16),   # bf16 MXU operand
                pltpu.VMEM((tm, 1), jnp.float32),    # running max
                pltpu.VMEM((tm, 1), jnp.float32),    # running sum
            ],
        ),
        compiler_params=pltpu.CompilerParams(
            dimension_semantics=("parallel", "arbitrary"),
            vmem_limit_bytes=vmem_budget,
        ),
        cost_estimate=cost,
    )(ids, table_f32, w_bf16, b_pad)

    return logp[:M, :V].reshape(B, S, V)


if __name__ == "__main__":
    # Small config consistent with the module:
    #   PRETRAINED_EMBED_DIM = 32, TGT_VOCAB_SIZE = 128, SRC vocab = 64
    B, S = 2, 8
    SRC_VOCAB = 64
    PRETRAINED_EMBED_DIM = 32
    TGT_VOCAB_SIZE = 128

    key = jax.random.PRNGKey(0)
    k_ids, k_emb, k_w, k_b = jax.random.split(key, 4)

    token_ids = jax.random.randint(k_ids, (B, S), 0, SRC_VOCAB, dtype=jnp.int32)
    embed_table = jax.random.normal(k_emb, (SRC_VOCAB, PRETRAINED_EMBED_DIM),
                                    dtype=jnp.float32) * 0.1
    w_proj = jax.random.normal(k_w, (PRETRAINED_EMBED_DIM, TGT_VOCAB_SIZE),
                               dtype=jnp.float32) * 0.05
    b_proj = jax.random.normal(k_b, (TGT_VOCAB_SIZE,), dtype=jnp.float32) * 0.01

    out = seq2seq_bert_forward(token_ids, embed_table, w_proj, b_proj)
    out = jax.block_until_ready(out)

    # Reference with matching precision (bf16 matmul operands, f32 softmax).
    x_ref = jnp.take(embed_table, token_ids.reshape(-1), axis=0).astype(jnp.bfloat16)
    z_ref = jnp.dot(x_ref, w_proj.astype(jnp.bfloat16),
                    preferred_element_type=jnp.float32) + b_proj
    ref = jax.nn.log_softmax(z_ref, axis=-1).reshape(B, S, TGT_VOCAB_SIZE)

    row_sums = jnp.exp(out).sum(axis=-1)
    assert out.shape == (B, S, TGT_VOCAB_SIZE)
    assert bool(jnp.allclose(row_sums, 1.0, atol=1e-4))
    assert bool(jnp.allclose(out, ref, atol=2e-2, rtol=2e-2))

    print("KERNEL_OK")
</pallas_src>

<mosaic_0001>
module attributes {stable_mosaic.version = 11 : i64} {
  func.func @_fused_head_kernel(%arg0: i32, %arg1: i32, %arg2: memref<16xi32, #tpu.memory_space<smem>>, %arg3: memref<64x32xf32, #tpu.memory_space<vmem>>, %arg4: memref<32x128xbf16, #tpu.memory_space<vmem>>, %arg5: memref<1x128xf32, #tpu.memory_space<vmem>>, %arg6: memref<8x128xf32, #tpu.memory_space<vmem>>, %arg7: memref<8x32xf32, #tpu.memory_space<vmem>>, %arg8: memref<8x32xbf16, #tpu.memory_space<vmem>>, %arg9: memref<8x1xf32, #tpu.memory_space<vmem>>, %arg10: memref<8x1xf32, #tpu.memory_space<vmem>>) attributes {dimension_semantics = [#tpu.dimension_semantics<parallel>, #tpu.dimension_semantics<arbitrary>], iteration_bounds = array<i64: 2, 1>, scalar_prefetch = 1 : i64, scratch_operands = 4 : i64, tpu.core_type = #tpu.core_type<tc>, window_params = [{pipeline_mode = #tpu.pipeline_mode<synchronous>, transform_indices = @transform_0, window_bounds = array<i64: 64, 32>}, {transform_indices = @transform_1, window_bounds = array<i64: 32, 128>}, {pipeline_mode = #tpu.pipeline_mode<synchronous>, transform_indices = @transform_2, window_bounds = array<i64: 1, 128>}, {transform_indices = @transform_3, window_bounds = array<i64: 8, 128>}]} {
    %c0_i32 = arith.constant 0 : i32
    %0 = arith.cmpi eq, %arg1, %c0_i32 : i32
    %1 = arith.extui %0 : i1 to i32
    %c0_i32_0 = arith.constant 0 : i32
    %2 = arith.cmpi ne, %1, %c0_i32_0 : i32
    scf.if %2 {
      %c8_i32 = arith.constant 8 : i32
      %33 = arith.muli %arg0, %c8_i32 : i32
      %c0_i32_18 = arith.constant 0 : i32
      %c8_i32_19 = arith.constant 8 : i32
      %34 = arith.addi %c0_i32_18, %c8_i32_19 : i32
      %c1_i32 = arith.constant 1 : i32
      scf.for %arg11 = %c0_i32_18 to %34 step %c1_i32  : i32 {
        %42 = arith.addi %33, %arg11 : i32
        %43 = arith.index_cast %42 : i32 to index
        %44 = memref.load %arg2[%43] : memref<16xi32, #tpu.memory_space<smem>>
        %45 = arith.index_cast %44 : i32 to index
        %c0_31 = arith.constant 0 : index
        %46 = vector.load %arg3[%45, %c0_31] : memref<64x32xf32, #tpu.memory_space<vmem>>, vector<1x32xf32>
        %47 = arith.index_cast %arg11 : i32 to index
        %c0_32 = arith.constant 0 : index
        %48 = vector.load %arg7[%47, %c0_32] : memref<8x32xf32, #tpu.memory_space<vmem>>, vector<1x32xf32>
        tpu.vector_store %arg7[%47, %c0_32], %46 {strides = array<i32>} : memref<8x32xf32, #tpu.memory_space<vmem>>, vector<1x32xf32>,
      }
      %c8_i32_20 = arith.constant 8 : i32
      %c0_21 = arith.constant 0 : index
      %c0_22 = arith.constant 0 : index
      %35 = vector.load %arg7[%c0_21, %c0_22] : memref<8x32xf32, #tpu.memory_space<vmem>>, vector<8x32xf32>
      %36 = arith.truncf %35 : vector<8x32xf32> to vector<8x32xbf16>
      %c0_23 = arith.constant 0 : index
      %c0_24 = arith.constant 0 : index
      %37 = vector.load %arg8[%c0_23, %c0_24] : memref<8x32xbf16, #tpu.memory_space<vmem>>, vector<8x32xbf16>
      tpu.vector_store %arg8[%c0_23, %c0_24], %36 {strides = array<i32>} : memref<8x32xbf16, #tpu.memory_space<vmem>>, vector<8x32xbf16>,
      %cst_25 = arith.constant 0xFF800000 : f32
      %38 = vector.broadcast %cst_25 : f32 to vector<8x1xf32>
      %c0_26 = arith.constant 0 : index
      %c0_27 = arith.constant 0 : index
      %39 = vector.load %arg9[%c0_26, %c0_27] : memref<8x1xf32, #tpu.memory_space<vmem>>, vector<8x1xf32>
      tpu.vector_store %arg9[%c0_26, %c0_27], %38 {strides = array<i32>} : memref<8x1xf32, #tpu.memory_space<vmem>>, vector<8x1xf32>,
      %cst_28 = arith.constant 0.000000e+00 : f32
      %40 = vector.broadcast %cst_28 : f32 to vector<8x1xf32>
      %c0_29 = arith.constant 0 : index
      %c0_30 = arith.constant 0 : index
      %41 = vector.load %arg10[%c0_29, %c0_30] : memref<8x1xf32, #tpu.memory_space<vmem>>, vector<8x1xf32>
      tpu.vector_store %arg10[%c0_29, %c0_30], %40 {strides = array<i32>} : memref<8x1xf32, #tpu.memory_space<vmem>>, vector<8x1xf32>,
    } else {
    }
    %c128_i32 = arith.constant 128 : i32
    %3 = arith.muli %arg1, %c128_i32 : i32
    %4 = tpu.assume_multiple %3, 128 : i32
    %c0 = arith.constant 0 : index
    %c0_1 = arith.constant 0 : index
    %5 = vector.load %arg8[%c0, %c0_1] : memref<8x32xbf16, #tpu.memory_space<vmem>>, vector<8x32xbf16>
    %c0_2 = arith.constant 0 : index
    %c0_3 = arith.constant 0 : index
    %6 = vector.load %arg4[%c0_2, %c0_3] : memref<32x128xbf16, #tpu.memory_space<vmem>>, vector<32x128xbf16>
    %cst = arith.constant dense<0.000000e+00> : vector<8x128xf32>
    %7 = tpu.matmul %5, %6, %cst {dimension_numbers = #tpu.dot_dimension_numbers<[1], [0], [0], [1], [0, 0, 1, 1], [], []>} : vector<8x32xbf16>, vector<32x128xbf16>, vector<8x128xf32> -> vector<8x128xf32>
    %c0_4 = arith.constant 0 : index
    %8 = arith.index_cast %4 : i32 to index
    %9 = vector.load %arg5[%c0_4, %8] : memref<1x128xf32, #tpu.memory_space<vmem>>, vector<1x128xf32>
    %10 = vector.broadcast %9 : vector<1x128xf32> to vector<8x128xf32>
    %11 = arith.addf %7, %10 : vector<8x128xf32>
    %c0_5 = arith.constant 0 : index
    %c0_6 = arith.constant 0 : index
    %12 = vector.load %arg9[%c0_5, %c0_6] : memref<8x1xf32, #tpu.memory_space<vmem>>, vector<8x1xf32>
    %cst_7 = arith.constant dense<0xFF800000> : vector<8xf32>
    %13 = vector.multi_reduction <maximumf>, %11, %cst_7 [1] : vector<8x128xf32> to vector<8xf32>
    %14 = vector.shape_cast %13 : vector<8xf32> to vector<8x1xf32>
    %15 = arith.maximumf %12, %14 : vector<8x1xf32>
    %c0_8 = arith.constant 0 : index
    %c0_9 = arith.constant 0 : index
    %16 = vector.load %arg10[%c0_8, %c0_9] : memref<8x1xf32, #tpu.memory_space<vmem>>, vector<8x1xf32>
    %17 = arith.subf %12, %15 : vector<8x1xf32>
    %18 = math.exp %17 : vector<8x1xf32>
    %19 = arith.mulf %16, %18 : vector<8x1xf32>
    %20 = vector.broadcast %15 : vector<8x1xf32> to vector<8x128xf32>
    %21 = arith.subf %11, %20 : vector<8x128xf32>
    %22 = math.exp %21 : vector<8x128xf32>
    %cst_10 = arith.constant dense<0.000000e+00> : vector<8xf32>
    %23 = vector.multi_reduction <add>, %22, %cst_10 [1] : vector<8x128xf32> to vector<8xf32>
    %24 = vector.shape_cast %23 : vector<8xf32> to vector<8x1xf32>
    %25 = arith.addf %19, %24 : vector<8x1xf32>
    %c0_11 = arith.constant 0 : index
    %c0_12 = arith.constant 0 : index
    %26 = vector.load %arg10[%c0_11, %c0_12] : memref<8x1xf32, #tpu.memory_space<vmem>>, vector<8x1xf32>
    tpu.vector_store %arg10[%c0_11, %c0_12], %25 {strides = array<i32>} : memref<8x1xf32, #tpu.memory_space<vmem>>, vector<8x1xf32>,
    %c0_13 = arith.constant 0 : index
    %c0_14 = arith.constant 0 : index
    %27 = vector.load %arg9[%c0_13, %c0_14] : memref<8x1xf32, #tpu.memory_space<vmem>>, vector<8x1xf32>
    tpu.vector_store %arg9[%c0_13, %c0_14], %15 {strides = array<i32>} : memref<8x1xf32, #tpu.memory_space<vmem>>, vector<8x1xf32>,
    %c0_15 = arith.constant 0 : index
    %28 = arith.index_cast %4 : i32 to index
    %29 = vector.load %arg6[%c0_15, %28] : memref<8x128xf32, #tpu.memory_space<vmem>>, vector<8x128xf32>
    tpu.vector_store %arg6[%c0_15, %28], %11 {strides = array<i32>} : memref<8x128xf32, #tpu.memory_space<vmem>>, vector<8x128xf32>,
    %c0_i32_16 = arith.constant 0 : i32
    %30 = arith.cmpi eq, %arg1, %c0_i32_16 : i32
    %31 = arith.extui %30 : i1 to i32
    %c0_i32_17 = arith.constant 0 : i32
    %32 = arith.cmpi ne, %31, %c0_i32_17 : i32
    scf.if %32 {
      %c0_18 = arith.constant 0 : index
      %c0_19 = arith.constant 0 : index
      %33 = vector.load %arg6[%c0_18, %c0_19] : memref<8x128xf32, #tpu.memory_space<vmem>>, vector<8x128xf32>
      %c0_20 = arith.constant 0 : index
      %c0_21 = arith.constant 0 : index
      %34 = vector.load %arg9[%c0_20, %c0_21] : memref<8x1xf32, #tpu.memory_space<vmem>>, vector<8x1xf32>
      %c0_22 = arith.constant 0 : index
      %c0_23 = arith.constant 0 : index
      %35 = vector.load %arg10[%c0_22, %c0_23] : memref<8x1xf32, #tpu.memory_space<vmem>>, vector<8x1xf32>
      %36 = math.log %35 : vector<8x1xf32>
      %37 = arith.addf %34, %36 : vector<8x1xf32>
      %38 = vector.broadcast %37 : vector<8x1xf32> to vector<8x128xf32>
      %39 = arith.subf %33, %38 : vector<8x128xf32>
      %c0_24 = arith.constant 0 : index
      %c0_25 = arith.constant 0 : index
      %40 = vector.load %arg6[%c0_24, %c0_25] : memref<8x128xf32, #tpu.memory_space<vmem>>, vector<8x128xf32>
      tpu.vector_store %arg6[%c0_24, %c0_25], %39 {strides = array<i32>} : memref<8x128xf32, #tpu.memory_space<vmem>>, vector<8x128xf32>,
    } else {
    }
    return
  }
  func.func @transform_0(%arg0: i32, %arg1: i32, %arg2: memref<16xi32, #tpu.memory_space<smem>>) -> (i32, i32) {
    %c0_i32 = arith.constant 0 : i32
    %c0_i32_0 = arith.constant 0 : i32
    %c0_i32_1 = arith.constant 0 : i32
    return %c0_i32, %c0_i32_0 : i32, i32
  }
  func.func @transform_1(%arg0: i32, %arg1: i32, %arg2: memref<16xi32, #tpu.memory_space<smem>>) -> (i32, i32) {
    %c0_i32 = arith.constant 0 : i32
    %c0_i32_0 = arith.constant 0 : i32
    return %c0_i32, %arg1 : i32, i32
  }
  func.func @transform_2(%arg0: i32, %arg1: i32, %arg2: memref<16xi32, #tpu.memory_space<smem>>) -> (i32, i32) {
    %c0_i32 = arith.constant 0 : i32
    %c0_i32_0 = arith.constant 0 : i32
    %c0_i32_1 = arith.constant 0 : i32
    return %c0_i32, %c0_i32_0 : i32, i32
  }
  func.func @transform_3(%arg0: i32, %arg1: i32, %arg2: memref<16xi32, #tpu.memory_space<smem>>) -> (i32, i32) {
    %c0_i32 = arith.constant 0 : i32
    %c0_i32_0 = arith.constant 0 : i32
    return %arg0, %c0_i32 : i32, i32
  }
}

</mosaic_0001>

<bundles_post_ra>
// kernel: tpu_custom_call.1
= control target key start
LH: loop header
LB: loop body
LE: loop exit
PB: predicated region body
PF: predicated region fallthrough
CT: control target
= control target key end

     0   :  { %s777_s0 = inlined_call_operand.vmem [shape: s32[16], index: 0, kind: input, shape index: {}]   ;;  %s778_s1 = inlined_call_operand.vmem [shape: f32[64,32], index: 1, kind: input, shape index: {}]   ;;  %s779_s2 = inlined_call_operand.vmem [shape: bf16[32,128], index: 2, kind: input, shape index: {}]   ;;  %s780_s3 = inlined_call_operand.vmem [shape: f32[1,128], index: 3, kind: input, shape index: {}]   ;;  %s781_s4 = inlined_call_operand.hbm [shape: f32[16,128], index: 4, kind: output, shape index: {}]  }
   0x1   :  { %s9_s17 = sshll.u32 %s777_s0, 4  ;;  %s10_s17 = int_to_ptr.vmem [resolvable:$true] %s9_s17 }
   0x2   :  { %s521_s18 = scalar_lea.vmem %s10_s17, 16  ;;  %p526_p1 = scmp.lt.s32.totalorder %s10_s17, %s10_s17 }
   0x3   :  { %p522_p0 = scmp.ne.s32.totalorder %s10_s17, %s521_s18  ;;  %p527_p2 = scmp.lt.s32.totalorder %s521_s18, %s521_s18 }
   0x5   :  { %p528_p3 = por %p527_p2, %p526_p1 }
   0x7   :  { %p529_p4 = pnand %p528_p3, %p522_p0 }
   0x9   :  { %532 = shalt.err (!%p529_p4)  }
   0xa   :  { %s621_s19 = smov [#allocation7]  }
   0xb   :  { %12 = dma.vmem_to_smem %s10_s17, 16, %s621_s19, [#allocation6] }
   0xc   :  { %587 = dma.done.wait [#allocation6], 16 }
   0xd   :  { %588 = vsyncadd [#allocation6], 4294967280 }
   0xe   :  { %14 = sfence }
   0xf   :  { %15 = vsyncpa [#allocation9], 0 }
  0x10   :  { %17 = vsyncpa [#allocation9 + $0x1], 0  ;;  %s655_s20 = smov 0   ;;  %s657_s21 = smov 0  }
  0x11   :  { %s659_s0 = smov 0   ;;  %s661_s22 = smov 0  }
  0x12   :  { %s663_s23 = smov 0   ;;  %s665_s24 = smov 0  }
  0x13 LB: > { %s417_s25 = sadd.s32 4294967295, %s615_s24   ;;  %s418_s26 = sadd.s32 4294967294, %s615_s24   ;;  %s615_s24 = sphi %s665_s24, %s23_s24   ;;  %s611_s23 = sphi %s663_s23, %s788_s23   ;;  %s607_s22 = sphi %s661_s22, %s787_s22   ;;  %s603_s0 = sphi %s659_s0, %s786_s0   ;;  %s599_s21 = sphi %s657_s21, %s785_s21   ;;  %s595_s20 = sphi %s655_s20, %s784_s20  }
  0x14   : > { %s35_s27 = sadd.s32 1, %s611_s23  ;;  %s110_s28 = sadd.s32 1, %s603_s0 }
  0x15   : > { %p37_p5 = scmp.ge.s32.totalorder %s35_s27, 2  ;;  %p120_p6 = scmp.ne.s32.totalorder %s603_s0, %s599_s21 }
  0x16   : > { %p121_p7 = scmp.eq.s32.totalorder %s417_s25, 1  ;;  %p126_p8 = scmp.ne.s32.totalorder %s599_s21, %s595_s20 }
  0x17   : > { %s790_s27 = smov (%p37_p5, %s35_s27), 0  ;;  %p127_p10 = scmp.eq.s32.totalorder %s418_s26, 1 }
  0x18   : > { %p695_p9 = por %p121_p7, %p120_p6  ;;  %s107_s30 = ssub.s32 %s611_s23, %s790_s27 }
  0x19   : > { %p421_p11 = scmp.ge.s32.totalorder %s615_s24, 1  ;;  %p108_p12 = scmp.eq.s32.totalorder %s107_s30, 0 }
  0x1a   : > { %p702_p13 = por %p127_p10, %p126_p8  ;;  %p158_p0 = scmp.lt.s32.totalorder %s615_s24, 3 }
  0x1b   : > { %s708_s6 = scalar_select %p108_p12, %s603_s0, %s110_s28  }
  0x1c   : > { %p159_p1 = pnand %p421_p11, %p158_p0 }
  0x1d   : > { %s178_s7 = sand.u32 (!%p159_p1), 1, %s599_s21   ;;  %s423_s8 = sshll.u32 (!%p159_p1), %s607_s22, 3 }
  0x1e   : > { %162 = sbr.rel (%p159_p1) target bundleno = 844 (0x34c), region = 32  ;;  %s714_s9 = sshll.u32 (!%p159_p1), %s178_s7, 3 }
  0x1f   : > { %s180_s10 = scalar_lea.vmem (!%p159_p1), [#allocation8], %s714_s9  ;;  %s617_s11 = smov (!%p159_p1), 0  }
  0x23 LB: >> { %s197_s12 = sadd.s32 %s619_s11, %s423_s8  ;;  %vm202_vm0 = vcmask 253952   ;;  %s201_s17 = scalar_lea.vmem [#allocation2], %s619_s11  ;;  %s619_s11 = sphi %s617_s11, %s196_s11  }
  0x24   : >> { %s198_s13 = sld [smem:[#allocation7 + %s197_s12]]  ;;  %s196_s11 = sadd.s32 1, %s619_s11  }
  0x25   : >> { %p193_p2 = scmp.ge.s32.totalorder %s196_s11, 8  }
  0x26   : > { %vm208_vm1 = vcmask (%p193_p2), 7168   ;;  %v622_v1 = vmov (%p193_p2), 0.0   ;;  %v513_v2 = vld [vmem:[%s779_s2 + $0x8] sm:$0xff] (%p193_p2)   ;;  %vm623_vm2 = vmmov (%p193_p2), 0   ;;  %vm206_vm3 = vcmask (%p193_p2), 257024   ;;  %v514_v4 = vld [vmem:[%s779_s2] sm:$0xff] (%p193_p2)  }
  0x27   : > { %210 = vst.msk [vmem:[#allocation5] sm:$0xff] (%p193_p2), %vm208_vm1, %v622_v1  ;;  %435 = vmatprep.subr.bf16.mxu0 (%p193_p2), %v622_v1  ;;  %439 = vmatprep.mubr.msk.bf16.mxu0 (%p193_p2), %vm623_vm2, %v622_v1  ;;  %vm239_vm4 = vcmask (%p193_p2), 261120   ;;  %v624_v7 = vmov (%p193_p2), -inf   ;;  %v424_v8 = vld [vmem:[%s780_s3] ss:$0 sm:$0xff] (%p193_p2)  ;;  %v625_v14 = vmov (%p193_p2), 0  }
  0x28   : > { %195 = sbr.rel (!%p193_p2) target bundleno = 35 (0x23), region = 86  ;;  %436 = vmatpush3.bf16.msra.mxu0 (%p193_p2), %v513_v2  ;;  %209 = vst.msk [vmem:[#allocation4] sm:$0xff] (%p193_p2), %vm208_vm1, %v624_v7  ;;  %511 = vset.pattern.permute.xlu0 (%p193_p2), %v625_v14  ;;  %s429_s8 = sshll.u32 (%p193_p2), %s607_s22, 7 }
  0x29   : > { %437 = vmatprep.subr.bf16.mxu0 (%p193_p2), %v622_v1  ;;  %512 = vset.pattern.permute.xlu1 (%p193_p2), %v625_v14  ;;  %s338_s11 = sshll.u32 (%p193_p2), %s180_s10, 4  ;;  %s336_s14 = scalar_lea.hbm (%p193_p2), %s781_s4, %s429_s8  ;;  %s339_s11 = int_to_ptr.vmem [resolvable:$true] %s338_s11 }
  0x2a   : >> { %s199_s16 = scalar_lea.vmem %s778_s1, %s198_s13  ;;  %s325_s15 = scalar_lea.sflag (%p193_p2), [#allocation9], %s178_s7 }
  0x2b   : >> { %v200_v0 = vld [vmem:[%s199_s16] sm:$0x1]  ;;  %s533_s16 = scalar_lea.vmem (%p193_p2), %s339_s11, 128 }
  0x2c   : >> { %203 = vst.msk [vmem:[%s201_s17] sm:$0x1] %vm202_vm0, %v200_v0  ;;  %438 = vmatpush3.bf16.msra.mxu0 (%p193_p2), %v514_v4  ;;  %p534_p3 = scmp.ne.s32.totalorder (%p193_p2), %s339_s11, %s533_s16  ;;  %s626_s17 = smov (%p193_p2), [#allocation8]  }
  0x2d   : > { %s537_s22 = sshll.u32 %s626_s17, 4  ;;  %s538_s22 = int_to_ptr.vmem [resolvable:$false] %s537_s22 }
  0x2e   : > { %v287_v25 = vld [vmem:[#allocation5] sm:$0xff]  ;;  %p535_p4 = pnand %p534_p3, %p695_p9  ;;  %s539_s18 = scalar_lea.vmem %s538_s22, 256 }
  0x2f   : > { %v283_v15 = vld [vmem:[#allocation4] sm:$0xff]  ;;  %p540_p6 = scmp.lt.s32.totalorder %s339_s11, %s538_s22  ;;  %p541_p7 = scmp.lt.s32.totalorder %s539_s18, %s533_s16 }
  0x30   : > { %p536_p5 = pneg %p535_p4 }
  0x31   : > { %p542_p8 = por %p541_p7, %p540_p6 }
  0x33   : > { %v204_v3 = vld [vmem:[#allocation2] sm:$0xff]  ;;  %p543_p10 = pnand %p542_p8, %p536_p5 }
  0x34   : > { %v205_v5 = vpack.c.bf16 %v204_v3, %v204_v3 }
  0x36   : > { %207 = vst.msk [vmem:[#allocation3] sm:$0xf] %vm206_vm3, %v205_v5 }
  0x3d   : > { %v212_v6 = vld [vmem:[#allocation3] sm:$0xf] }
  0x3e   : > { %440 = vmatmul.mubr.msk.bf16.vlgmr.msra.gmra.mxu0 %vm239_vm4, %v212_v6 }
  0xfe   : > { %v277_v9 = vpop.f32.mrf.mxu0 }
  0xff   : > { %v278_v10 = vadd.f32 %v424_v8, %v277_v9 }
 0x100   : > { %v441_v11 = vpop.f32.mrf.mxu0 }
 0x101   : > { %284 = vmax.xlane.f32.xlu0 %v278_v10 }
 0x102   : > { %v280_v12 = vpop.f32.mrf.mxu0 }
 0x104   : > { %v442_v13 = vpop.f32.mrf.mxu0 }
 0x18a   : > { %v285_v16 = vpop.xlane.xlu0 %284 }
 0x18b   : > { %v286_v17 = vmax.f32 %v283_v15, %v285_v16 }
 0x18d   : > { %v288_v18 = vsub.f32 %v283_v15, %v286_v17  ;;  %305 = vst.msk [vmem:[#allocation4] sm:$0xff] %vm208_vm1, %v286_v17  ;;  %294 = vperm.xlu0 %511, %v286_v17  }
 0x18f   : > { %v289_v23 = vmul.f32 1.442695, %v288_v18 }
 0x194   : > { %v312_v32 = vld [vmem:[#allocation4] sm:$0xff] }
 0x208   : > { %v295_v19 = vpop.permute.xlu0 %294 }
 0x209   : > { %v297_v20 = vsub.f32 %v278_v10, %v295_v19 }
 0x20b   : > { %v298_v21 = vmul.f32 1.442695, %v297_v20 }
 0x20d   : > { %515 = vpow2.f32 %v298_v21 }
 0x20e   : > { %517 = vpow2.f32 %v289_v23 }
 0x21a   : > { %v516_v22 = vpop.eup %515 }
 0x21b   : > { %300 = vadd.xlane.f32.xlu1 %v516_v22  ;;  %v518_v24 = vpop.eup %517 }
 0x21c   : > { %v291_v26 = vmul.f32 %v518_v24, %v287_v25 }
 0x2a4   : > { %v301_v27 = vpop.xlane.xlu1 %300 }
 0x2a5   : > { %v302_v28 = vadd.f32 %v301_v27, %v291_v26 }
 0x2a7   : > { %304 = vst.msk [vmem:[#allocation5] sm:$0xff] %vm208_vm1, %v302_v28 }
 0x2ae   : > { %v313_v29 = vld [vmem:[#allocation5] sm:$0xff] }
 0x2af   : > { %519 = vlog2.f32 %v313_v29 }
 0x2bc   : > { %v520_v30 = vpop.eup %519 }
 0x2bd   : > { %v315_v31 = vmul.f32 0.6931472, %v520_v30 }
 0x2bf   : > { %v316_v33 = vadd.f32 %v315_v31, %v312_v32 }
 0x2c1   : > { %319 = vperm.xlu1 %512, %v316_v33  }
 0x33c   : > { %v320_v34 = vpop.permute.xlu1 %319 }
 0x33d   : > { %v322_v35 = vsub.f32 %v278_v10, %v320_v34 }
 0x33f   : > { %323 = vst [vmem:[%s180_s10] sm:$0xff] %v322_v35 }
 0x340   : > { %546 = shalt.err (!%p543_p10)
}
 0x341   : > { %s547_s19 = scalar_lea.hbm %s336_s14, 128  ;;  %s551_s10 = scalar_lea.hbm %s781_s4, 256 }
 0x342   : > { %p548_p11 = scmp.ne.s32.totalorder %s336_s14, %s547_s19  ;;  %p552_p1 = scmp.lt.s32.totalorder %s336_s14, %s781_s4 }
 0x343   : > { %p553_p2 = scmp.lt.s32.totalorder %s551_s10, %s547_s19 }
 0x344   : > { %p549_p12 = pnand %p548_p11, %p695_p9 }
 0x345   : > { %p554_p3 = por %p553_p2, %p552_p1 }
 0x346   : > { %p550_p0 = pneg %p549_p12 }
 0x348   : > { %p555_p4 = pnand %p554_p3, %p550_p0 }
 0x34a   : > { %558 = shalt.err (!%p555_p4)
}
 0x34b   : > { %443 = dma.vmem_to_hbm [thread:$0]  (%p695_p9), %s339_s11, 128, %s336_s14, %s325_s15  }
 0x34c PF: > { %p449_p5 = scmp.ge.s32.totalorder %s615_s24, 2  ;;  %s350_s28 = sand.u32 1, %s595_s20  }
 0x34d   : > { %s351_s30 = scalar_lea.sflag [#allocation9], %s350_s28 }
 0x34e   : > { %p446_p6 = pnand %p449_p5, %p702_p13 }
 0x350   : > { %p447_p7 = pneg %p446_p6 }
 0x352   : > { %590 = dma.done.wait (%p447_p7), %s351_s30, 128  }
 0x353   : > { %592 = vsyncadd (%p447_p7), %s351_s30, 4294967168  ;;  %s23_s24 = sadd.s32 1, %s615_s24   ;;  %s784_s20 = smov %s599_s21 }
 0x354   : > { %p20_p8 = scmp.ge.s32.totalorder %s23_s24, 4   ;;  %s785_s21 = smov %s603_s0 }
 0x355   : > { %s786_s0 = smov %s708_s6  ;;  %s787_s22 = smov %s611_s23 }
 0x356   : > { %s788_s23 = smov %s790_s27  ;;  %22 = sbr.rel (!%p20_p8) target bundleno = 19 (0x13), region = 97 }
 0x35b   :  { %356 = vsyncpa [#allocation9], 1 }
 0x35c   :  { %358 = vsyncpa [#allocation9 + $0x1], 1 }

</bundles_post_ra>
